<compile_context>
chip_gen: v7x
topology: tpu7x:2x2x1
jax: 0.10.0
libtpu: 0.0.40
codegen_flags: <defaults>
</compile_context>

<pallas_src>
import jax
import jax.numpy as jnp
from jax.experimental import pallas as pl
from jax.experimental.pallas import tpu as pltpu


def _round_up(x, m):
    return (x + m - 1) // m * m


def _cdiv(a, b):
    return -(-a // b)


def _sublane_multiple(dtype):
    return {4: 8, 2: 16, 1: 32}.get(jnp.dtype(dtype).itemsize, 8)


def _pick_budget():
    """(target_block_bytes, vmem_limit_bytes) tuned per TPU generation."""
    try:
        cap = int(getattr(pltpu.get_tpu_info(), "vmem_capacity_bytes", 0))
    except Exception:
        cap = 0
    if cap >= (96 << 20):            # v5e / v6e: 128 MiB VMEM -> bigger blocks, fewer steps
        return 12 << 20, 80 << 20
    return 5 << 20, 40 << 20         # v7x (64 MiB / TC) or unknown: leave headroom


def _choose_tiles(B, S, H, itemsize, sub_q, target_bytes):
    """Pick (tile_b, tile_s, need_seq_pad). No input padding in the common path."""
    row_bytes = max(S * H * itemsize, 1)          # one full-sequence batch row

    # --- batch tile: sublane-aligned or full-B; never requires padding (overhang ok) ---
    tb_cap = min(B, max(1, target_bytes // row_bytes))
    tb = (tb_cap // sub_q) * sub_q
    if tb == 0:
        tb = min(B, sub_q)
    if tb >= B:
        if B > sub_q:
            # keep >= 2 batch tiles so the "parallel" axis can use both v7x TensorCores
            tb = _round_up(_cdiv(B, 2), sub_q)
        else:
            tb = B

    # --- seq tile: whole sequence, or a 128-aligned divisor of S (no padding) ---
    if tb * row_bytes <= 2 * target_bytes:
        return tb, S, False
    ts_target = max(128, target_bytes // max(tb * H * itemsize, 1))
    ts_target = min(ts_target, S)
    cand = (ts_target // 128) * 128
    while cand >= 128:
        if S % cand == 0:
            return tb, cand, False
        cand -= 128
    # Rare fallback: S has no 128-aligned divisor under the budget -> pad seq with zeros.
    ts = max(128, (ts_target // 128) * 128)
    return tb, ts, True


def _mean_pool_kernel(x_ref, w_ref, inv_len_ref, o_ref, acc_ref):
    # x_ref: (tb, ts, H) input dtype; w_ref: (tb, ts) keep weights (0/1, input dtype)
    # inv_len_ref: (tb, 1) f32; o_ref: (tb, H) input dtype; acc_ref: (tb, H) f32 scratch
    s = pl.program_id(1)

    @pl.when(s == 0)
    def _():
        acc_ref[...] = jnp.zeros_like(acc_ref)

    # Batched (1, ts) @ (ts, H) masked reduction on the MXU, f32 accumulation.
    part = jax.lax.dot_general(
        w_ref[...][:, None, :], x_ref[...],
        dimension_numbers=(((2,), (1,)), ((0,), (0,))),
        precision=jax.lax.Precision.HIGHEST,
        preferred_element_type=jnp.float32)          # (tb, 1, H)
    acc_ref[...] += part[:, 0, :]

    @pl.when(s == pl.num_programs(1) - 1)
    def _():
        o_ref[...] = (acc_ref[...] * inv_len_ref[...]).astype(o_ref.dtype)


def mean_pool(inputs, mask_or_lengths, *, target_block_bytes=None, vmem_limit_bytes=None):
    """Masked mean pooling over the sequence dimension (Pallas TPU kernel)."""
    B, S, H = inputs.shape
    dtype = inputs.dtype

    # Normalize to (keep-weights, lengths), matching the PyTorch module.
    if mask_or_lengths.ndim == 1:
        lengths = mask_or_lengths.astype(jnp.float32)                          # (B,)
        keep = (jnp.arange(S, dtype=jnp.int32)[None, :]
                < mask_or_lengths[:, None]).astype(dtype)                      # (B, S)
    else:
        keep = (1 - mask_or_lengths.astype(jnp.int32)).astype(dtype)           # (B, S)
        lengths = (1.0 - mask_or_lengths.astype(jnp.float32)).sum(axis=1)      # (B,)
    inv_len = (1.0 / lengths).reshape(B, 1)   # len==0 -> inf -> NaN out (matches torch)

    default_target, default_limit = _pick_budget()
    target = default_target if target_block_bytes is None else target_block_bytes
    vmem_limit = default_limit if vmem_limit_bytes is None else vmem_limit_bytes

    itemsize = jnp.dtype(dtype).itemsize
    sub_q = _sublane_multiple(dtype)
    tb, ts, need_seq_pad = _choose_tiles(B, S, H, itemsize, sub_q, target)

    x = inputs
    if need_seq_pad:
        # Rare fallback: genuine zeros, so zero weights never meet garbage data.
        S_pad = _round_up(S, ts)
        x = jnp.pad(x, ((0, 0), (0, S_pad - S), (0, 0)))
        keep = jnp.pad(keep, ((0, 0), (0, S_pad - S)))
        S_eff = S_pad
    else:
        S_eff = S

    grid = (_cdiv(B, tb), S_eff // ts)
    out = pl.pallas_call(
        _mean_pool_kernel,
        out_shape=jax.ShapeDtypeStruct((B, H), dtype),
        grid_spec=pltpu.PrefetchScalarGridSpec(
            num_scalar_prefetch=0,
            grid=grid,
            in_specs=[
                pl.BlockSpec((tb, ts, H), lambda b, s: (b, s, 0)),
                pl.BlockSpec((tb, ts), lambda b, s: (b, s)),
                pl.BlockSpec((tb, 1), lambda b, s: (b, 0)),
            ],
            out_specs=pl.BlockSpec((tb, H), lambda b, s: (b, 0)),
            scratch_shapes=[pltpu.VMEM((tb, H), jnp.float32)],
        ),
        compiler_params=pltpu.CompilerParams(
            dimension_semantics=("parallel", "arbitrary"),
            vmem_limit_bytes=vmem_limit,
        ),
    )(x, keep, inv_len)
    return out


def _ref_mean_pool(inputs, lengths):
    pad_mask = jnp.arange(inputs.shape[1])[None, :] >= lengths[:, None]
    masked = jnp.where(pad_mask[:, :, None], 0.0, inputs)
    return masked.sum(axis=1) / lengths.astype(jnp.float32)[:, None]


if __name__ == "__main__":
    # --- small check (lengths variant + 2-D pad-mask variant), single block ---
    batch, seq, hidden = 2, 8, 32
    key = jax.random.PRNGKey(0)
    inputs = jax.random.normal(key, (batch, seq, hidden), dtype=jnp.float32)
    lengths = jnp.array([5, 8], dtype=jnp.int32)

    out_len = jax.block_until_ready(mean_pool(inputs, lengths))
    pad_mask = jnp.arange(seq)[None, :] >= lengths[:, None]
    out_mask = jax.block_until_ready(mean_pool(inputs, pad_mask))

    ref = _ref_mean_pool(inputs, lengths)
    assert out_len.shape == (batch, hidden)
    assert jnp.allclose(out_len, ref, atol=1e-5, rtol=1e-5)
    assert jnp.allclose(out_mask, ref, atol=1e-5, rtol=1e-5)

    # --- exercise batch overhang (B % tb != 0) and multi-tile seq reduction ---
    B2, S2, H2 = 20, 256, 128
    x2 = jax.random.normal(jax.random.PRNGKey(1), (B2, S2, H2), dtype=jnp.float32)
    len2 = jax.random.randint(jax.random.PRNGKey(2), (B2,), 1, S2 + 1).astype(jnp.int32)
    ref2 = _ref_mean_pool(x2, len2)

    # default budget: batch-tiled with an overhanging last block, ts = S
    out2a = jax.block_until_ready(mean_pool(x2, len2))
    # tiny forced budget: batch tiles of 8 (overhang) AND seq tiles of 128 (accumulator path)
    out2b = jax.block_until_ready(mean_pool(x2, len2, target_block_bytes=64 * 1024))

    assert jnp.allclose(out2a, ref2, atol=1e-4, rtol=1e-4)
    assert jnp.allclose(out2b, ref2, atol=1e-4, rtol=1e-4)

    print("KERNEL_OK")
</pallas_src>

<mosaic_0001>
module attributes {stable_mosaic.version = 11 : i64} {
  func.func @_mean_pool_kernel(%arg0: i32, %arg1: i32, %arg2: memref<2x8x32xf32, #tpu.memory_space<vmem>>, %arg3: memref<2x8xf32, #tpu.memory_space<vmem>>, %arg4: memref<2x1xf32, #tpu.memory_space<vmem>>, %arg5: memref<2x32xf32, #tpu.memory_space<vmem>>, %arg6: memref<2x32xf32, #tpu.memory_space<vmem>>) attributes {dimension_semantics = [#tpu.dimension_semantics<parallel>, #tpu.dimension_semantics<arbitrary>], iteration_bounds = array<i64: 1, 1>, scalar_prefetch = 0 : i64, scratch_operands = 1 : i64, tpu.core_type = #tpu.core_type<tc>, window_params = [{transform_indices = @transform_0, window_bounds = array<i64: 2, 8, 32>}, {transform_indices = @transform_1, window_bounds = array<i64: 2, 8>}, {transform_indices = @transform_2, window_bounds = array<i64: 2, 1>}, {transform_indices = @transform_3, window_bounds = array<i64: 2, 32>}]} {
    %c0_i32 = arith.constant 0 : i32
    %0 = arith.cmpi eq, %arg1, %c0_i32 : i32
    %1 = arith.extui %0 : i1 to i32
    %c0_i32_0 = arith.constant 0 : i32
    %2 = arith.cmpi ne, %1, %c0_i32_0 : i32
    scf.if %2 {
      %cst_11 = arith.constant 0.000000e+00 : f32
      %14 = vector.broadcast %cst_11 : f32 to vector<2x32xf32>
      %c0_12 = arith.constant 0 : index
      %c0_13 = arith.constant 0 : index
      %15 = vector.load %arg6[%c0_12, %c0_13] : memref<2x32xf32, #tpu.memory_space<vmem>>, vector<2x32xf32>
      tpu.vector_store %arg6[%c0_12, %c0_13], %14 {strides = array<i32>} : memref<2x32xf32, #tpu.memory_space<vmem>>, vector<2x32xf32>,
    } else {
    }
    %c0 = arith.constant 0 : index
    %c0_1 = arith.constant 0 : index
    %3 = vector.load %arg3[%c0, %c0_1] : memref<2x8xf32, #tpu.memory_space<vmem>>, vector<2x8xf32>
    %4 = vector.shape_cast %3 : vector<2x8xf32> to vector<2x1x8xf32>
    %c0_2 = arith.constant 0 : index
    %c0_3 = arith.constant 0 : index
    %c0_4 = arith.constant 0 : index
    %5 = vector.load %arg2[%c0_2, %c0_3, %c0_4] : memref<2x8x32xf32, #tpu.memory_space<vmem>>, vector<2x8x32xf32>
    %cst = arith.constant dense<0.000000e+00> : vector<2x1x32xf32>
    %6 = tpu.matmul %4, %5, %cst {dimension_numbers = #tpu.dot_dimension_numbers<[2], [1], [1], [2], [0, 0, 0, 1, 1, 2], [0], [0]>, precision = #tpu.contract_precision<fp32>} : vector<2x1x8xf32>, vector<2x8x32xf32>, vector<2x1x32xf32> -> vector<2x1x32xf32>
    %c0_5 = arith.constant 0 : index
    %c0_6 = arith.constant 0 : index
    %7 = vector.load %arg6[%c0_5, %c0_6] : memref<2x32xf32, #tpu.memory_space<vmem>>, vector<2x32xf32>
    %8 = vector.shape_cast %6 : vector<2x1x32xf32> to vector<2x32xf32>
    %9 = arith.addf %7, %8 : vector<2x32xf32>
    %c0_7 = arith.constant 0 : index
    %c0_8 = arith.constant 0 : index
    %10 = vector.load %arg6[%c0_7, %c0_8] : memref<2x32xf32, #tpu.memory_space<vmem>>, vector<2x32xf32>
    tpu.vector_store %arg6[%c0_7, %c0_8], %9 {strides = array<i32>} : memref<2x32xf32, #tpu.memory_space<vmem>>, vector<2x32xf32>,
    %c0_i32_9 = arith.constant 0 : i32
    %11 = arith.cmpi eq, %arg1, %c0_i32_9 : i32
    %12 = arith.extui %11 : i1 to i32
    %c0_i32_10 = arith.constant 0 : i32
    %13 = arith.cmpi ne, %12, %c0_i32_10 : i32
    scf.if %13 {
      %c0_11 = arith.constant 0 : index
      %c0_12 = arith.constant 0 : index
      %14 = vector.load %arg6[%c0_11, %c0_12] : memref<2x32xf32, #tpu.memory_space<vmem>>, vector<2x32xf32>
      %c0_13 = arith.constant 0 : index
      %c0_14 = arith.constant 0 : index
      %15 = vector.load %arg4[%c0_13, %c0_14] : memref<2x1xf32, #tpu.memory_space<vmem>>, vector<2x1xf32>
      %16 = vector.broadcast %15 : vector<2x1xf32> to vector<2x32xf32>
      %17 = arith.mulf %14, %16 : vector<2x32xf32>
      %c0_15 = arith.constant 0 : index
      %c0_16 = arith.constant 0 : index
      %18 = vector.load %arg5[%c0_15, %c0_16] : memref<2x32xf32, #tpu.memory_space<vmem>>, vector<2x32xf32>
      tpu.vector_store %arg5[%c0_15, %c0_16], %17 {strides = array<i32>} : memref<2x32xf32, #tpu.memory_space<vmem>>, vector<2x32xf32>,
    } else {
    }
    return
  }
  func.func @transform_0(%arg0: i32, %arg1: i32) -> (i32, i32, i32) {
    %c0_i32 = arith.constant 0 : i32
    %c0_i32_0 = arith.constant 0 : i32
    return %arg0, %arg1, %c0_i32 : i32, i32, i32
  }
  func.func @transform_1(%arg0: i32, %arg1: i32) -> (i32, i32) {
    %c0_i32 = arith.constant 0 : i32
    return %arg0, %arg1 : i32, i32
  }
  func.func @transform_2(%arg0: i32, %arg1: i32) -> (i32, i32) {
    %c0_i32 = arith.constant 0 : i32
    %c0_i32_0 = arith.constant 0 : i32
    return %arg0, %c0_i32 : i32, i32
  }
  func.func @transform_3(%arg0: i32, %arg1: i32) -> (i32, i32) {
    %c0_i32 = arith.constant 0 : i32
    %c0_i32_0 = arith.constant 0 : i32
    return %arg0, %c0_i32 : i32, i32
  }
}

</mosaic_0001>

<bundles_post_ra>
// kernel: tpu_custom_call.1
= control target key start
LH: loop header
LB: loop body
LE: loop exit
PB: predicated region body
PF: predicated region fallthrough
CT: control target
= control target key end

     0   :  { %8 = vsyncpa [#allocation4], 0  ;;  %s1269_s0 = inlined_call_operand.hbm [shape: f32[2,8,32], index: 0, kind: input, shape index: {}]   ;;  %s1270_s1 = inlined_call_operand.vmem [shape: f32[2,8], index: 1, kind: input, shape index: {}]   ;;  %s1271_s2 = inlined_call_operand.vmem [shape: f32[2,1], index: 2, kind: input, shape index: {}]   ;;  %s1272_s3 = inlined_call_operand.hbm [shape: f32[2,32], index: 3, kind: output, shape index: {}]  }
   0x1   :  { %9 = vsyncpa [#allocation5], 0  ;;  %s1157_s12 = smov [#allocation3]   ;;  %s1109_s16 = scalar_lea.hbm %s1269_s0, 256 }
   0x2   :  { %s15_s13 = sshll.u32 %s1157_s12, 4  ;;  %p1110_p0 = scmp.ne.s32.totalorder %s1269_s0, %s1109_s16  ;;  %s16_s13 = int_to_ptr.vmem [resolvable:$true] %s15_s13 }
   0x3   :  { %p1113_p1 = scmp.lt.u32.totalorder %s1109_s16, %s1269_s0 }
   0x5   :  { %p1115_p2 = pnand %p1113_p1, %p1110_p0 }
   0x7   :  { %1118 = shalt.err (!%p1115_p2)
}
   0x8   :  { %s1119_s21 = scalar_lea.vmem %s16_s13, 256  ;;  %p1124_p4 = scmp.lt.s32.totalorder %s16_s13, %s16_s13 }
   0x9   :  { %p1120_p3 = scmp.ne.s32.totalorder %s16_s13, %s1119_s21  ;;  %p1125_p5 = scmp.lt.s32.totalorder %s1119_s21, %s1119_s21 }
   0xb   :  { %p1126_p6 = por %p1125_p5, %p1124_p4 }
   0xd   :  { %p1127_p7 = pnand %p1126_p6, %p1120_p3 }
   0xf   :  { %1130 = shalt.err (!%p1127_p7)
}
  0x10   :  { %s1158_s22 = smov 128   ;;  %s1159_s23 = smov 8  }
  0x11   :  { %21 = dma.hbm_to_vmem [thread:$0]  %s1269_s0, 256, %s16_s13, [#allocation4], %s1158_s22, %s1158_s22, %s1159_s23  }
  0x12   :  { %1153 = dma.done.wait [#allocation4], 256  }
  0x13   :  { %1154 = vsyncadd [#allocation4], 4294967040  ;;  %v48_v0 = vlaneseq  ;;  %v1160_v1 = vmov 0.0   ;;  %vm1161_vm0 = vmmov 0   ;;  %v1162_v2 = vmov 1966171168  }
  0x14   :  { %1020 = vmatprep.subr.mxu0 %v1160_v1  ;;  %1022 = vmatprep.mubr.msk.f32.mxu0 %vm1161_vm0, %v1160_v1  ;;  %v46_v3 = vunpack.c.l.s4 %v1162_v2  ;;  %v1163_v6 = vmov 0   ;;  %vm61_vm1 = vcmask 64512   ;;  %v59_v8 = vld [vmem:[#allocation3] sm:$0xff]  ;;  %v60_v10 = vld [vmem:[#allocation3 + $0x8] sm:$0xff]  ;;  %v972_v15 = vld [vmem:[%s1271_s2] sm:$0x3] }
  0x15   :  { %1050 = vmatprep.subr.mxu1 %v1160_v1  ;;  %v49_v4 = vshrl.u32 %v48_v0, 7  ;;  %1052 = vmatprep.mubr.msk.f32.mxu1 %vm1161_vm0, %v1160_v1  ;;  %v995_v9 = vld.sshfl [vmem:[%s1270_s1] sm:$0x11 pattern:$0x75316420]  ;;  %v1206_v11 = vand.u32 4294901760, %v59_v8 }
  0x16   :  { %v47_v5 = vunpack.c.0.s8 %v46_v3  ;;  %1108 = vset.pattern.permute.xlu0 %v1163_v6  ;;  %v1208_v13 = vand.u32 4294901760, %v60_v10  ;;  %v44_v14 = vcombine.high %v995_v9, %v995_v9  ;;  %vm33_vm2 = vcmask 254976   ;;  %s1164_s1 = smov [#allocation6]  }
  0x17   :  { %975 = vperm.xlu0 %1108, %v972_v15   ;;  %1021 = vmatpush3.msra.mxu0 %v1206_v11  ;;  %v142_v16 = vsub.f32 %v59_v8, %v1206_v11  ;;  %34 = vst.msk [vmem:[#allocation2] sm:$0x3] %vm33_vm2, %v1160_v1  ;;  %vm962_vm3 = vcmask 1041409   ;;  %s986_s2 = sshll.u32 %s1164_s1, 4  ;;  %s987_s2 = int_to_ptr.vmem [resolvable:$true] %s986_s2 }
  0x18   :  { %v50_v7 = vsub.s32 %v47_v5, %v49_v4  ;;  %1051 = vmatpush3.msra.mxu1 %v1208_v13  ;;  %v590_v18 = vsub.f32 %v60_v10, %v1208_v13  ;;  %1025 = vmatprep.subr.mxu0 %v1160_v1  ;;  %s1131_s29 = scalar_lea.vmem %s987_s2, 32  ;;  %p1136_p9 = scmp.lt.s32.totalorder %s987_s2, %s987_s2 }
  0x19   :  { %1055 = vmatprep.subr.mxu1 %v1160_v1  ;;  %v143_v23 = vand.u32 4294901760, %v142_v16  ;;  %p1132_p8 = scmp.ne.s32.totalorder %s987_s2, %s1131_s29  ;;  %p1137_p10 = scmp.lt.s32.totalorder %s1131_s29, %s1131_s29 }
  0x1a   :  { %v51_v12 = vrot.slane %v995_v9, %v50_v7  ;;  %v58_v19 = vrot.slane %v44_v14, %v50_v7  ;;  %v591_v22 = vand.u32 4294901760, %v590_v18 }
  0x1b   :  { %v144_v26 = vsub.f32 %v142_v16, %v143_v23  ;;  %p1138_p11 = por %p1137_p10, %p1136_p9 }
  0x1c   :  { %v62_v17 = vsel %vm61_vm1, %v51_v12, 0  ;;  %v510_v21 = vsel %vm61_vm1, %v58_v19, 0  ;;  %v592_v29 = vsub.f32 %v590_v18, %v591_v22 }
  0x1d   :  { %v130_v20 = vand.u32 4294901760, %v62_v17  ;;  %v578_v25 = vand.u32 4294901760, %v510_v21  ;;  %v145_v32 = vand.u32 4294901760, %v144_v26  ;;  %p1139_p12 = pnand %p1138_p11, %p1132_p8 }
  0x1e   :  { %v593_v35 = vand.u32 4294901760, %v592_v29  ;;  %v958_v42 = vld [vmem:[#allocation2] sm:$0x3] }
  0x1f   :  { %v131_v24 = vsub.f32 %v62_v17, %v130_v20  ;;  %v579_v28 = vsub.f32 %v510_v21, %v578_v25 }
  0x21   :  { %v132_v27 = vand.u32 4294901760, %v131_v24  ;;  %v580_v31 = vand.u32 4294901760, %v579_v28 }
  0x23   :  { %v133_v30 = vsub.f32 %v131_v24, %v132_v27  ;;  %v581_v34 = vsub.f32 %v579_v28, %v580_v31 }
  0x25   :  { %v134_v33 = vand.u32 4294901760, %v133_v30  ;;  %v582_v36 = vand.u32 4294901760, %v581_v34 }
  0x27   :  { %1023 = vmatmul.mubr.f32.vlgmr.msra.gmra.mrb[0].mxu0 %v134_v33  ;;  %1053 = vmatmul.mubr.f32.vlgmr.msra.gmra.mrb[0].mxu1 %v582_v36 }
  0x28   :  { %1026 = vmatpush3.msra.mxu0 %v145_v32  ;;  %1027 = vmatprep.mubr.msk.f32.mxu0 %vm1161_vm0, %v1160_v1 }
  0x29   :  { %1030 = vmatprep.subr.mxu0 %v1160_v1  ;;  %1056 = vmatpush3.msra.mxu1 %v593_v35 }
  0x2a   :  { %1057 = vmatprep.mubr.msk.f32.mxu1 %vm1161_vm0, %v1160_v1  ;;  %1060 = vmatprep.subr.mxu1 %v1160_v1 }
  0x2f   :  { %1028 = vmatmul.mubr.f32.vlgmr.msra.gmra.mrb[0].mxu0 %v130_v20  ;;  %1058 = vmatmul.mubr.f32.vlgmr.msra.gmra.mrb[0].mxu1 %v578_v25 }
  0x30   :  { %1031 = vmatpush3.msra.mxu0 %v142_v16  ;;  %1032 = vmatprep.mubr.msk.f32.mxu0 %vm1161_vm0, %v1160_v1 }
  0x31   :  { %1035 = vmatprep.subr.mxu0 %v1160_v1  ;;  %1061 = vmatpush3.msra.mxu1 %v590_v18 }
  0x32   :  { %1062 = vmatprep.mubr.msk.f32.mxu1 %vm1161_vm0, %v1160_v1  ;;  %1065 = vmatprep.subr.mxu1 %v1160_v1 }
  0x37   :  { %1033 = vmatmul.mubr.f32.vlgmr.msra.gmra.mrb[0].mxu0 %v131_v24  ;;  %1063 = vmatmul.mubr.f32.vlgmr.msra.gmra.mrb[0].mxu1 %v579_v28 }
  0x38   :  { %1036 = vmatpush3.msra.mxu0 %v1206_v11  ;;  %1037 = vmatprep.mubr.msk.f32.mxu0 %vm1161_vm0, %v1160_v1 }
  0x39   :  { %1040 = vmatprep.subr.mxu0 %v1160_v1  ;;  %1066 = vmatpush3.msra.mxu1 %v1208_v13 }
  0x3a   :  { %1067 = vmatprep.mubr.msk.f32.mxu1 %vm1161_vm0, %v1160_v1  ;;  %1070 = vmatprep.subr.mxu1 %v1160_v1 }
  0x3f   :  { %1038 = vmatmul.mubr.f32.vlgmr.msra.gmra.mrb[0].mxu0 %v132_v27  ;;  %1068 = vmatmul.mubr.f32.vlgmr.msra.gmra.mrb[0].mxu1 %v580_v31 }
  0x40   :  { %1041 = vmatpush3.msra.mxu0 %v143_v23  ;;  %1042 = vmatprep.mubr.msk.f32.mxu0 %vm1161_vm0, %v1160_v1 }
  0x41   :  { %1045 = vmatprep.subr.mxu0 %v1160_v1  ;;  %1071 = vmatpush3.msra.mxu1 %v591_v22 }
  0x42   :  { %1072 = vmatprep.mubr.msk.f32.mxu1 %vm1161_vm0, %v1160_v1  ;;  %1075 = vmatprep.subr.mxu1 %v1160_v1 }
  0x47   :  { %1043 = vmatmul.mubr.f32.vlgmr.msra.gmra.mrb[0].mxu0 %v130_v20  ;;  %1073 = vmatmul.mubr.f32.vlgmr.msra.gmra.mrb[0].mxu1 %v578_v25 }
  0x48   :  { %1046 = vmatpush3.msra.mxu0 %v1206_v11  ;;  %1047 = vmatprep.mubr.msk.f32.mxu0 %vm1161_vm0, %v1160_v1 }
  0x49   :  { %1076 = vmatpush3.msra.mxu1 %v1208_v13  ;;  %1077 = vmatprep.mubr.msk.f32.mxu1 %vm1161_vm0, %v1160_v1 }
  0x4f   :  { %1048 = vmatmul.mubr.f32.vlgmr.msra.gmra.mrb[0].mxu0 %v130_v20  ;;  %1078 = vmatmul.mubr.f32.vlgmr.msra.gmra.mrb[0].mxu1 %v578_v25 }
  0x96   :  { %v976_v45 = vpop.permute.xlu0 %975 }
 0x122   :  { %v506_v37 = vpop.f32.mrb[0].mxu0  ;;  %v954_v39 = vpop.f32.mrb[0].mxu1 }
 0x123   :  { %v1049_v38 = vpop.f32.mrb[1].mxu0  ;;  %v961_v40 = vrot.slane %v954_v39, 7  ;;  %v1079_v41 = vpop.f32.mrb[1].mxu1 }
 0x125   :  { %v963_v43 = vsel %vm962_vm3, %v961_v40, %v506_v37 }
 0x126   :  { %v965_v44 = vadd.f32 %v963_v43, %v958_v42 }
 0x128   :  { %967 = vst.msk [vmem:[#allocation2] sm:$0x3] %vm33_vm2, %v965_v44 }
 0x12f   :  { %v971_v46 = vld [vmem:[#allocation2] sm:$0x3] }
 0x130   :  { %v978_v47 = vmul.f32 %v976_v45, %v971_v46 }
 0x132   :  { %979 = vst.msk [vmem:[#allocation6] sm:$0x3] %vm33_vm2, %v978_v47 }
 0x133   :  { %1142 = shalt.err (!%p1139_p12)
}
 0x134   :  { %s1143_s5 = scalar_lea.hbm %s1272_s3, 32 }
 0x135   :  { %p1144_p13 = scmp.ne.s32.totalorder %s1272_s3, %s1143_s5  ;;  %p1147_p0 = scmp.lt.u32.totalorder %s1143_s5, %s1272_s3 }
 0x137   :  { %p1149_p1 = pnand %p1147_p0, %p1144_p13 }
 0x139   :  { %1152 = shalt.err (!%p1149_p1)
}
 0x13a   :  { %989 = dma.vmem_to_hbm [thread:$0]  %s987_s2, 32, %s1272_s3, [#allocation5]  }
 0x13b   :  { %1155 = dma.done.wait [#allocation5], 32  }
 0x13c   :  { %1156 = vsyncadd [#allocation5], 4294967264 }
 0x13d   :  { %993 = vsyncpa [#allocation4], 1 }
 0x13e   :  { %994 = vsyncpa [#allocation5], 1 }

</bundles_post_ra>
